<compile_context>
chip_gen: v7x
topology: tpu7x:2x2x1
jax: 0.10.0
libtpu: 0.0.40
codegen_flags: <defaults>
</compile_context>

<pallas_src>
import jax
import jax.numpy as jnp
import numpy as np
from jax.experimental import pallas as pl
from jax.experimental.pallas import tpu as pltpu

EPS = 1e-5


# ----------------------------- kernel helpers --------------------------------
def _bn_fold(z, gamma, beta):
    """Training-mode BatchNorm folded to a per-feature scale/shift.

    Returns (a, b) such that BN(z) == z * a + b, using a single reduction pass
    over the batch axis (biased variance via E[z^2] - mu^2).
    """
    mu = jnp.mean(z, axis=0, keepdims=True)
    ez2 = jnp.mean(z * z, axis=0, keepdims=True)
    var = ez2 - mu * mu
    a = gamma * jax.lax.rsqrt(var + EPS)
    b = beta - mu * a
    return a, b


def lstm_kernel(x_ref, hx_ref, cxw_ref, wi_ref, wh_ref, p_ref, out_ref):
    H4 = out_ref.shape[1]
    H = H4 // 4

    # Packed per-feature parameters (one small VMEM tile):
    #   rows 0/1: i2h BN gamma / beta
    #   rows 2/3: h2h BN gamma / beta
    #   rows 4/5: cx  BN gamma / beta, pre-placed in lanes [H, 2H) (zeros elsewhere)
    P = p_ref[...]

    # MXU matmuls in the input dtype (bf16 inputs use the native bf16 MXU path),
    # f32 accumulation.  Linear biases omitted: training-mode BN subtracts the batch
    # mean, which absorbs any constant bias, so the forward output is unchanged.
    i2h = jnp.dot(x_ref[...], wi_ref[...], preferred_element_type=jnp.float32)
    h2h = jnp.dot(hx_ref[...], wh_ref[...], preferred_element_type=jnp.float32)

    a1, b1 = _bn_fold(i2h, P[0:1, :], P[1:2, :])
    a2, b2 = _bn_fold(h2h, P[2:3, :], P[3:4, :])
    pre = i2h * a1 + h2h * a2 + (b1 + b2)            # (B, 4H) = [ i | f | o | g ]

    # Full-lane-width transcendentals (EUP slot, essentially free).
    sig = jax.nn.sigmoid(pre)                        # sigma of every gate block
    th = jnp.tanh(pre)                               # tanh  of every gate block

    # cx arrives pre-placed in lanes [H, 2H).  Align gates with XLU rolls so that
    # in lane-block 1:   sig -> sigma(f),  roll(sig,H) -> sigma(i),  roll(th,2H) -> tanh(g)
    cx_w = cxw_ref[...].astype(jnp.float32)
    cx_new = (sig * cx_w
              + pltpu.roll(sig, shift=H, axis=1) * pltpu.roll(th, shift=2 * H, axis=1))

    # Cell-state BN, full width; gamma/beta live only in lanes [H, 2H) so the other
    # (don't-care) lane blocks collapse to zero.
    ac, bc = _bn_fold(cx_new, P[4:5, :], P[5:6, :])
    t = jnp.tanh(cx_new * ac + bc)

    # hx_new in lane-block 0:   roll(sig,2H) -> sigma(o),  roll(t,3H) -> tanh(BN(cx_new))
    hx_new = pltpu.roll(sig, shift=2 * H, axis=1) * pltpu.roll(t, shift=3 * H, axis=1)

    # Single lane-dense (B, 4H) output: [ hx_new | cx_new | 0 | 0 ].
    lane = jax.lax.broadcasted_iota(jnp.int32, (pre.shape[0], H4), 1)
    out = jnp.where(lane < H, hx_new, jnp.where(lane < 2 * H, cx_new, 0.0))
    out_ref[...] = out.astype(out_ref.dtype)


# ------------------------------- wrapper --------------------------------------
@jax.jit
def lstm_cell_pallas(x, hx, cx, params):
    B = x.shape[0]
    H = hx.shape[1]
    H4 = 4 * H

    # Pack the small per-feature parameter vectors into one array (single DMA).
    zH = jnp.zeros((1, H), jnp.float32)
    p_packed = jnp.concatenate(
        [params["i2h_g"], params["i2h_b"],
         params["h2h_g"], params["h2h_b"],
         jnp.concatenate([zH, params["cx_g"], zH, zH], axis=1),
         jnp.concatenate([zH, params["cx_b"], zH, zH], axis=1)],
        axis=0).astype(jnp.float32)                           # (6, 4H)

    # Place cx into lanes [H, 2H) of a full-width (B, 4H) slab.
    cx_w = jnp.pad(cx.astype(jnp.float32), ((0, 0), (H, 2 * H)))

    vmem = pl.BlockSpec(memory_space=pltpu.MemorySpace.VMEM)
    packed = pl.pallas_call(
        lstm_kernel,
        out_shape=jax.ShapeDtypeStruct((B, H4), jnp.float32),
        in_specs=[vmem] * 6,
        out_specs=vmem,
    )(x, hx, cx_w, params["wi"], params["wh"], p_packed)

    hx_new = packed[:, :H]
    cx_new = packed[:, H:2 * H]
    return hx_new, cx_new


# ---------------------- pure-JAX reference (faithful torch forward) -----------
def _bn_train(z, gamma, beta):
    mu = jnp.mean(z, axis=0, keepdims=True)
    var = jnp.mean((z - mu) ** 2, axis=0, keepdims=True)
    return (z - mu) * jax.lax.rsqrt(var + EPS) * gamma + beta


def lstm_cell_ref(x, hx, cx, params):
    i2h = x @ params["wi"] + params["bi"]
    h2h = hx @ params["wh"] + params["bh"]
    pre = (_bn_train(i2h, params["i2h_g"], params["i2h_b"]) +
           _bn_train(h2h, params["h2h_g"], params["h2h_b"]))
    H = hx.shape[1]
    gates = jax.nn.sigmoid(pre[:, :3 * H])
    in_g, f_g, o_g = gates[:, :H], gates[:, H:2 * H], gates[:, 2 * H:3 * H]
    g = jnp.tanh(pre[:, 3 * H:])
    cx_new = f_g * cx + in_g * g
    hx_new = o_g * jnp.tanh(_bn_train(cx_new, params["cx_g"], params["cx_b"]))
    return hx_new, cx_new


def init_params(key, input_size, hidden_size):
    H4 = 4 * hidden_size
    k_wi, k_bi, k_wh, k_bh = jax.random.split(key, 4)
    bnd_i = 1.0 / np.sqrt(input_size)
    bnd_h = 1.0 / np.sqrt(hidden_size)
    return {
        "wi": jax.random.uniform(k_wi, (input_size, H4), jnp.float32, -bnd_i, bnd_i),
        "bi": jax.random.uniform(k_bi, (1, H4), jnp.float32, -bnd_i, bnd_i),
        "wh": jax.random.uniform(k_wh, (hidden_size, H4), jnp.float32, -bnd_h, bnd_h),
        "bh": jax.random.uniform(k_bh, (1, H4), jnp.float32, -bnd_h, bnd_h),
        "i2h_g": jnp.ones((1, H4), jnp.float32), "i2h_b": jnp.zeros((1, H4), jnp.float32),
        "h2h_g": jnp.ones((1, H4), jnp.float32), "h2h_b": jnp.zeros((1, H4), jnp.float32),
        "cx_g": jnp.ones((1, hidden_size), jnp.float32),
        "cx_b": jnp.zeros((1, hidden_size), jnp.float32),
    }


if __name__ == "__main__":
    B, INPUT_SIZE, HIDDEN_SIZE = 8, 16, 32

    key = jax.random.PRNGKey(0)
    k_p, k_x, k_h, k_c = jax.random.split(key, 4)
    params = init_params(k_p, INPUT_SIZE, HIDDEN_SIZE)
    x = jax.random.normal(k_x, (B, INPUT_SIZE), jnp.float32)
    hx = jax.random.normal(k_h, (B, HIDDEN_SIZE), jnp.float32)
    cx = jax.random.normal(k_c, (B, HIDDEN_SIZE), jnp.float32)

    hx_new, cx_new = lstm_cell_pallas(x, hx, cx, params)
    jax.block_until_ready((hx_new, cx_new))

    hx_ref, cx_ref = lstm_cell_ref(x, hx, cx, params)
    np.testing.assert_allclose(np.asarray(hx_new), np.asarray(hx_ref), rtol=1e-4, atol=1e-4)
    np.testing.assert_allclose(np.asarray(cx_new), np.asarray(cx_ref), rtol=1e-4, atol=1e-4)

    print("KERNEL_OK")
</pallas_src>

<mosaic_0001>
module attributes {stable_mosaic.version = 11 : i64} {
  func.func @lstm_kernel(%arg0: memref<8x16xf32, #tpu.memory_space<vmem>>, %arg1: memref<8x32xf32, #tpu.memory_space<vmem>>, %arg2: memref<8x128xf32, #tpu.memory_space<vmem>>, %arg3: memref<16x128xf32, #tpu.memory_space<vmem>>, %arg4: memref<32x128xf32, #tpu.memory_space<vmem>>, %arg5: memref<6x128xf32, #tpu.memory_space<vmem>>, %arg6: memref<8x128xf32, #tpu.memory_space<vmem>>) attributes {dimension_semantics = [], scalar_prefetch = 0 : i64, scratch_operands = 0 : i64, tpu.core_type = #tpu.core_type<tc>} {
    %c0 = arith.constant 0 : index
    %c0_0 = arith.constant 0 : index
    %0 = vector.load %arg5[%c0, %c0_0] : memref<6x128xf32, #tpu.memory_space<vmem>>, vector<6x128xf32>
    %c0_1 = arith.constant 0 : index
    %c0_2 = arith.constant 0 : index
    %1 = vector.load %arg0[%c0_1, %c0_2] : memref<8x16xf32, #tpu.memory_space<vmem>>, vector<8x16xf32>
    %c0_3 = arith.constant 0 : index
    %c0_4 = arith.constant 0 : index
    %2 = vector.load %arg3[%c0_3, %c0_4] : memref<16x128xf32, #tpu.memory_space<vmem>>, vector<16x128xf32>
    %cst = arith.constant dense<0.000000e+00> : vector<8x128xf32>
    %3 = tpu.matmul %1, %2, %cst {dimension_numbers = #tpu.dot_dimension_numbers<[1], [0], [0], [1], [0, 0, 1, 1], [], []>} : vector<8x16xf32>, vector<16x128xf32>, vector<8x128xf32> -> vector<8x128xf32>
    %c0_5 = arith.constant 0 : index
    %c0_6 = arith.constant 0 : index
    %4 = vector.load %arg1[%c0_5, %c0_6] : memref<8x32xf32, #tpu.memory_space<vmem>>, vector<8x32xf32>
    %c0_7 = arith.constant 0 : index
    %c0_8 = arith.constant 0 : index
    %5 = vector.load %arg4[%c0_7, %c0_8] : memref<32x128xf32, #tpu.memory_space<vmem>>, vector<32x128xf32>
    %cst_9 = arith.constant dense<0.000000e+00> : vector<8x128xf32>
    %6 = tpu.matmul %4, %5, %cst_9 {dimension_numbers = #tpu.dot_dimension_numbers<[1], [0], [0], [1], [0, 0, 1, 1], [], []>} : vector<8x32xf32>, vector<32x128xf32>, vector<8x128xf32> -> vector<8x128xf32>
    %7 = vector.extract_strided_slice %0 {offsets = [0, 0], sizes = [1, 128], strides = [1, 1]} : vector<6x128xf32> to vector<1x128xf32>
    %8 = vector.extract_strided_slice %0 {offsets = [1, 0], sizes = [1, 128], strides = [1, 1]} : vector<6x128xf32> to vector<1x128xf32>
    %cst_10 = arith.constant dense<0.000000e+00> : vector<128xf32>
    %9 = vector.multi_reduction <add>, %3, %cst_10 [0] : vector<8x128xf32> to vector<128xf32>
    %10 = vector.shape_cast %9 : vector<128xf32> to vector<1x128xf32>
    %cst_11 = arith.constant 8.000000e+00 : f32
    %11 = vector.broadcast %cst_11 : f32 to vector<1x128xf32>
    %12 = arith.divf %10, %11 : vector<1x128xf32>
    %13 = arith.mulf %3, %3 : vector<8x128xf32>
    %cst_12 = arith.constant dense<0.000000e+00> : vector<128xf32>
    %14 = vector.multi_reduction <add>, %13, %cst_12 [0] : vector<8x128xf32> to vector<128xf32>
    %15 = vector.shape_cast %14 : vector<128xf32> to vector<1x128xf32>
    %cst_13 = arith.constant 8.000000e+00 : f32
    %16 = vector.broadcast %cst_13 : f32 to vector<1x128xf32>
    %17 = arith.divf %15, %16 : vector<1x128xf32>
    %18 = arith.mulf %12, %12 : vector<1x128xf32>
    %19 = arith.subf %17, %18 : vector<1x128xf32>
    %cst_14 = arith.constant 9.99999974E-6 : f32
    %20 = vector.broadcast %cst_14 : f32 to vector<1x128xf32>
    %21 = arith.addf %19, %20 : vector<1x128xf32>
    %22 = math.rsqrt %21 : vector<1x128xf32>
    %23 = arith.mulf %7, %22 : vector<1x128xf32>
    %24 = arith.mulf %12, %23 : vector<1x128xf32>
    %25 = arith.subf %8, %24 : vector<1x128xf32>
    %26 = vector.extract_strided_slice %0 {offsets = [2, 0], sizes = [1, 128], strides = [1, 1]} : vector<6x128xf32> to vector<1x128xf32>
    %27 = vector.extract_strided_slice %0 {offsets = [3, 0], sizes = [1, 128], strides = [1, 1]} : vector<6x128xf32> to vector<1x128xf32>
    %cst_15 = arith.constant dense<0.000000e+00> : vector<128xf32>
    %28 = vector.multi_reduction <add>, %6, %cst_15 [0] : vector<8x128xf32> to vector<128xf32>
    %29 = vector.shape_cast %28 : vector<128xf32> to vector<1x128xf32>
    %cst_16 = arith.constant 8.000000e+00 : f32
    %30 = vector.broadcast %cst_16 : f32 to vector<1x128xf32>
    %31 = arith.divf %29, %30 : vector<1x128xf32>
    %32 = arith.mulf %6, %6 : vector<8x128xf32>
    %cst_17 = arith.constant dense<0.000000e+00> : vector<128xf32>
    %33 = vector.multi_reduction <add>, %32, %cst_17 [0] : vector<8x128xf32> to vector<128xf32>
    %34 = vector.shape_cast %33 : vector<128xf32> to vector<1x128xf32>
    %cst_18 = arith.constant 8.000000e+00 : f32
    %35 = vector.broadcast %cst_18 : f32 to vector<1x128xf32>
    %36 = arith.divf %34, %35 : vector<1x128xf32>
    %37 = arith.mulf %31, %31 : vector<1x128xf32>
    %38 = arith.subf %36, %37 : vector<1x128xf32>
    %cst_19 = arith.constant 9.99999974E-6 : f32
    %39 = vector.broadcast %cst_19 : f32 to vector<1x128xf32>
    %40 = arith.addf %38, %39 : vector<1x128xf32>
    %41 = math.rsqrt %40 : vector<1x128xf32>
    %42 = arith.mulf %26, %41 : vector<1x128xf32>
    %43 = arith.mulf %31, %42 : vector<1x128xf32>
    %44 = arith.subf %27, %43 : vector<1x128xf32>
    %45 = vector.broadcast %23 : vector<1x128xf32> to vector<8x128xf32>
    %46 = arith.mulf %3, %45 : vector<8x128xf32>
    %47 = vector.broadcast %42 : vector<1x128xf32> to vector<8x128xf32>
    %48 = arith.mulf %6, %47 : vector<8x128xf32>
    %49 = arith.addf %46, %48 : vector<8x128xf32>
    %50 = arith.addf %25, %44 : vector<1x128xf32>
    %51 = vector.broadcast %50 : vector<1x128xf32> to vector<8x128xf32>
    %52 = arith.addf %49, %51 : vector<8x128xf32>
    %53 = arith.negf %52 : vector<8x128xf32>
    %54 = math.exp %53 : vector<8x128xf32>
    %cst_20 = arith.constant 1.000000e+00 : f32
    %55 = vector.broadcast %cst_20 : f32 to vector<8x128xf32>
    %56 = arith.addf %55, %54 : vector<8x128xf32>
    %57 = arith.divf %55, %56 : vector<8x128xf32>
    %58 = math.tanh %52 : vector<8x128xf32>
    %c0_21 = arith.constant 0 : index
    %c0_22 = arith.constant 0 : index
    %59 = vector.load %arg2[%c0_21, %c0_22] : memref<8x128xf32, #tpu.memory_space<vmem>>, vector<8x128xf32>
    %60 = arith.mulf %57, %59 : vector<8x128xf32>
    %c32_i32 = arith.constant 32 : i32
    %61 = tpu.dynamic_rotate %57 by %c32_i32 dim 1 : vector<8x128xf32>, i32 -> vector<8x128xf32>
    %c64_i32 = arith.constant 64 : i32
    %62 = tpu.dynamic_rotate %58 by %c64_i32 dim 1 : vector<8x128xf32>, i32 -> vector<8x128xf32>
    %63 = arith.mulf %61, %62 : vector<8x128xf32>
    %64 = arith.addf %60, %63 : vector<8x128xf32>
    %65 = vector.extract_strided_slice %0 {offsets = [4, 0], sizes = [1, 128], strides = [1, 1]} : vector<6x128xf32> to vector<1x128xf32>
    %66 = vector.extract_strided_slice %0 {offsets = [5, 0], sizes = [1, 128], strides = [1, 1]} : vector<6x128xf32> to vector<1x128xf32>
    %cst_23 = arith.constant dense<0.000000e+00> : vector<128xf32>
    %67 = vector.multi_reduction <add>, %64, %cst_23 [0] : vector<8x128xf32> to vector<128xf32>
    %68 = vector.shape_cast %67 : vector<128xf32> to vector<1x128xf32>
    %cst_24 = arith.constant 8.000000e+00 : f32
    %69 = vector.broadcast %cst_24 : f32 to vector<1x128xf32>
    %70 = arith.divf %68, %69 : vector<1x128xf32>
    %71 = arith.mulf %64, %64 : vector<8x128xf32>
    %cst_25 = arith.constant dense<0.000000e+00> : vector<128xf32>
    %72 = vector.multi_reduction <add>, %71, %cst_25 [0] : vector<8x128xf32> to vector<128xf32>
    %73 = vector.shape_cast %72 : vector<128xf32> to vector<1x128xf32>
    %cst_26 = arith.constant 8.000000e+00 : f32
    %74 = vector.broadcast %cst_26 : f32 to vector<1x128xf32>
    %75 = arith.divf %73, %74 : vector<1x128xf32>
    %76 = arith.mulf %70, %70 : vector<1x128xf32>
    %77 = arith.subf %75, %76 : vector<1x128xf32>
    %cst_27 = arith.constant 9.99999974E-6 : f32
    %78 = vector.broadcast %cst_27 : f32 to vector<1x128xf32>
    %79 = arith.addf %77, %78 : vector<1x128xf32>
    %80 = math.rsqrt %79 : vector<1x128xf32>
    %81 = arith.mulf %65, %80 : vector<1x128xf32>
    %82 = arith.mulf %70, %81 : vector<1x128xf32>
    %83 = arith.subf %66, %82 : vector<1x128xf32>
    %84 = vector.broadcast %81 : vector<1x128xf32> to vector<8x128xf32>
    %85 = arith.mulf %64, %84 : vector<8x128xf32>
    %86 = vector.broadcast %83 : vector<1x128xf32> to vector<8x128xf32>
    %87 = arith.addf %85, %86 : vector<8x128xf32>
    %88 = math.tanh %87 : vector<8x128xf32>
    %c64_i32_28 = arith.constant 64 : i32
    %89 = tpu.dynamic_rotate %57 by %c64_i32_28 dim 1 : vector<8x128xf32>, i32 -> vector<8x128xf32>
    %c96_i32 = arith.constant 96 : i32
    %90 = tpu.dynamic_rotate %88 by %c96_i32 dim 1 : vector<8x128xf32>, i32 -> vector<8x128xf32>
    %91 = arith.mulf %89, %90 : vector<8x128xf32>
    %92 = tpu.iota {dimensions = array<i32: 1>} : vector<8x128xi32>
    %c32_i32_29 = arith.constant 32 : i32
    %93 = vector.broadcast %c32_i32_29 : i32 to vector<8x128xi32>
    %94 = arith.cmpi slt, %92, %93 : vector<8x128xi32>
    %c64_i32_30 = arith.constant 64 : i32
    %95 = vector.broadcast %c64_i32_30 : i32 to vector<8x128xi32>
    %96 = arith.cmpi slt, %92, %95 : vector<8x128xi32>
    %cst_31 = arith.constant 0.000000e+00 : f32
    %97 = vector.broadcast %cst_31 : f32 to vector<8x128xf32>
    %98 = arith.select %96, %64, %97 : vector<8x128xi1>, vector<8x128xf32>
    %99 = arith.select %94, %91, %98 : vector<8x128xi1>, vector<8x128xf32>
    %c0_32 = arith.constant 0 : index
    %c0_33 = arith.constant 0 : index
    %100 = vector.load %arg6[%c0_32, %c0_33] : memref<8x128xf32, #tpu.memory_space<vmem>>, vector<8x128xf32>
    tpu.vector_store %arg6[%c0_32, %c0_33], %99 {strides = array<i32>} : memref<8x128xf32, #tpu.memory_space<vmem>>, vector<8x128xf32>,
    return
  }
}

</mosaic_0001>

<bundles_post_ra>
// kernel: lstm_cell_pallas.1
= control target key start
LH: loop header
LB: loop body
LE: loop exit
PB: predicated region body
PF: predicated region fallthrough
CT: control target
= control target key end

     0   :  { %11 = vsyncpa [#allocation3], 0  ;;  %s563_s0 = inlined_call_operand.hbm [shape: f32[8,16], index: 0, kind: input, shape index: {}]   ;;  %s564_s1 = inlined_call_operand.hbm [shape: f32[8,32], index: 1, kind: input, shape index: {}]   ;;  %s565_s2 = inlined_call_operand.vmem [shape: f32[8,128], index: 2, kind: input, shape index: {}]   ;;  %s566_s3 = inlined_call_operand.vmem [shape: f32[16,128], index: 3, kind: input, shape index: {}]   ;;  %s567_s4 = inlined_call_operand.vmem [shape: f32[32,128], index: 4, kind: input, shape index: {}]   ;;  %s568_s5 = inlined_call_operand.vmem [shape: f32[6,128], index: 5, kind: input, shape index: {}]   ;;  %s569_s6 = inlined_call_operand.vmem [shape: f32[8,128], index: 6, kind: output, shape index: {}]  }
   0x1   :  { %12 = vsyncpa [#allocation5], 0  ;;  %s452_s21 = smov [#allocation2]   ;;  %s453_s23 = smov [#allocation4]  }
   0x2   :  { %s19_s22 = sshll.u32 %s452_s21, 4  ;;  %s29_s24 = sshll.u32 %s453_s23, 4  ;;  %s20_s22 = int_to_ptr.vmem [resolvable:$true] %s19_s22  ;;  %s30_s24 = int_to_ptr.vmem [resolvable:$true] %s29_s24 }
   0x3   :  { %s404_s27 = scalar_lea.hbm %s563_s0, 128 }
   0x4   :  { %p405_p0 = scmp.ne.s32.totalorder %s563_s0, %s404_s27  ;;  %p408_p1 = scmp.lt.u32.totalorder %s404_s27, %s563_s0 }
   0x6   :  { %p410_p2 = pnand %p408_p1, %p405_p0 }
   0x8   :  { %413 = shalt.err (!%p410_p2)
}
   0x9   :  { %s414_s8 = scalar_lea.vmem %s20_s22, 128  ;;  %p419_p4 = scmp.lt.s32.totalorder %s20_s22, %s20_s22 }
   0xa   :  { %p415_p3 = scmp.ne.s32.totalorder %s20_s22, %s414_s8  ;;  %p420_p5 = scmp.lt.s32.totalorder %s414_s8, %s414_s8 }
   0xc   :  { %p421_p6 = por %p420_p5, %p419_p4 }
   0xe   :  { %p422_p7 = pnand %p421_p6, %p415_p3 }
  0x10   :  { %425 = shalt.err (!%p422_p7)
}
  0x11   :  { %22 = dma.hbm_to_vmem [thread:$0]  %s563_s0, 128, %s20_s22, [#allocation3]  }
  0x12   :  { %s426_s13 = scalar_lea.hbm %s564_s1, 128 }
  0x13   :  { %p427_p8 = scmp.ne.s32.totalorder %s564_s1, %s426_s13  ;;  %p430_p9 = scmp.lt.u32.totalorder %s426_s13, %s564_s1 }
  0x15   :  { %p432_p10 = pnand %p430_p9, %p427_p8 }
  0x17   :  { %435 = shalt.err (!%p432_p10)
}
  0x18   :  { %s436_s18 = scalar_lea.vmem %s30_s24, 128  ;;  %p441_p12 = scmp.lt.s32.totalorder %s30_s24, %s30_s24 }
  0x19   :  { %p437_p11 = scmp.ne.s32.totalorder %s30_s24, %s436_s18  ;;  %p442_p13 = scmp.lt.s32.totalorder %s436_s18, %s436_s18 }
  0x1b   :  { %p443_p0 = por %p442_p13, %p441_p12 }
  0x1d   :  { %p444_p1 = pnand %p443_p0, %p437_p11 }
  0x1f   :  { %447 = shalt.err (!%p444_p1)
}
  0x20   :  { %32 = dma.hbm_to_vmem [thread:$0]  %s564_s1, 128, %s30_s24, [#allocation5]  }
  0x21   :  { %448 = dma.done.wait [#allocation3], 128  }
  0x22   :  { %449 = vsyncadd [#allocation3], 4294967168 }
  0x23   :  { %450 = dma.done.wait [#allocation5], 128  }
  0x24   :  { %451 = vsyncadd [#allocation5], 4294967168  ;;  %v454_v0 = vmov 0.0|0.0   ;;  %vm455_vm0 = vmmov 0   ;;  %v456_v1 = vmov 0.0   ;;  %v49_v2 = vld [vmem:[%s566_s3] sm:$0xff]  ;;  %v255_v53 = vlaneseq }
  0x25   :  { %373 = vmatprep.subr.bf16.mxu0 %v454_v0  ;;  %376 = vmatprep.subr.bf16.mxu1 %v454_v0  ;;  %v50_v3 = vld [vmem:[%s566_s3 + $0x8] sm:$0xff]  ;;  %v126_v4 = vld [vmem:[%s567_s4] sm:$0xff]  ;;  %v128_v7 = vld [vmem:[%s567_s4 + $0x10] sm:$0xff]  ;;  %vm51_vm1 = vcmask 130048   ;;  %vm130_vm2 = vcmask 261120   ;;  %s458_s7 = smov 32  }
  0x26   :  { %359 = vmatprep.mubr.msk.f32.mxu0 %vm455_vm0, %v456_v1  ;;  %370 = vmatprep.mubr.msk.f32.mxu1 %vm455_vm0, %v456_v1  ;;  %v374_v5 = vpack.c.bf16 %v50_v3, %v49_v2  ;;  %v127_v6 = vld [vmem:[%s567_s4 + $0x8] sm:$0xff]  ;;  %v129_v9 = vld [vmem:[%s567_s4 + $0x18] sm:$0xff]  ;;  %v48_v10 = vld [vmem:[#allocation2] sm:$0xff]  ;;  %v538_v54 = vshrl.u32 %v255_v53, 7 }
  0x27   :  { %v377_v8 = vpack.c.bf16 %v127_v6, %v126_v4  ;;  %v380_v11 = vpack.c.bf16 %v129_v9, %v128_v7  ;;  %v125_v12 = vld [vmem:[#allocation4] sm:$0xff]  ;;  %v543_v55 = vld [vmem:[%s568_s5] sm:$0x3f]  ;;  %s457_s5 = smov 64  }
  0x28   :  { %375 = vmatpush3.bf16.msra.mxu0 %v374_v5  ;;  %v257_v58 = vsub.s32 0, %v538_v54  ;;  %v262_v59 = vsub.s32 2, %v538_v54 }
  0x29   :  { %378 = vmatpush3.bf16.msra.mxu1 %v377_v8 }
  0x2a   :  { %379 = vmatprep.subr.bf16.mxu1 %v454_v0 }
  0x2b   :  { %360 = vmatmul.mubr.msk.f32.vlgmr.msra.gmra.mrb[0].mxu0 %vm51_vm1, %v48_v10  ;;  %v272_v10 = vsub.s32 1, %v538_v54 }
  0x2d   :  { %381 = vmatpush3.bf16.msra.mxu1 %v380_v11 }
  0x30   :  { %371 = vmatmul.mubr.msk.f32.vlgmr.msra.gmra.mrb[0].mxu1 %vm130_vm2, %v125_v12 }
  0xfe   :  { %v121_v13 = vpop.f32.mrb[0].mxu0 }
  0xff   :  { %v204_v14 = vrot.slane %v121_v13, 4  ;;  %v212_v15 = vmul.f32 %v121_v13, %v121_v13  ;;  %v361_v16 = vpop.f32.mrb[1].mxu0 }
 0x101   :  { %v205_v17 = vadd.f32 %v204_v14, %v121_v13  ;;  %v213_v18 = vrot.slane %v212_v15, 4 }
 0x103   :  { %v206_v19 = vrot.slane %v205_v17, 2  ;;  %v214_v20 = vadd.f32 %v213_v18, %v212_v15  ;;  %v200_v21 = vpop.f32.mrb[0].mxu1 }
 0x104   :  { %v230_v22 = vrot.slane %v200_v21, 4  ;;  %v237_v23 = vmul.f32 %v200_v21, %v200_v21  ;;  %v372_v24 = vpop.f32.mrb[1].mxu1 }
 0x105   :  { %v207_v25 = vadd.f32 %v206_v19, %v205_v17  ;;  %v215_v26 = vrot.slane %v214_v20, 2 }
 0x106   :  { %v231_v27 = vadd.f32 %v230_v22, %v200_v21  ;;  %v238_v28 = vrot.slane %v237_v23, 4 }
 0x107   :  { %v208_v29 = vrot.slane %v207_v25, 1  ;;  %v216_v30 = vadd.f32 %v215_v26, %v214_v20  ;;  %v282_v20 = vld [vmem:[%s565_s2] sm:$0xff]  ;;  %s459_s2 = smov 96  }
 0x108   :  { %v232_v31 = vrot.slane %v231_v27, 2  ;;  %v239_v32 = vadd.f32 %v238_v28, %v237_v23 }
 0x109   :  { %v209_v33 = vadd.f32 %v208_v29, %v207_v25  ;;  %v217_v34 = vrot.slane %v216_v30, 1 }
 0x10a   :  { %v233_v35 = vadd.f32 %v232_v31, %v231_v27  ;;  %v240_v36 = vrot.slane %v239_v32, 2 }
 0x10b   :  { %v211_v37 = vmul.f32 0.125, %v209_v33  ;;  %v218_v38 = vadd.f32 %v217_v34, %v216_v30 }
 0x10c   :  { %v234_v39 = vrot.slane %v233_v35, 1  ;;  %v241_v40 = vadd.f32 %v240_v36, %v239_v32 }
 0x10d   :  { %v219_v41 = vmul.f32 0.125, %v218_v38  ;;  %v220_v42 = vmul.f32 %v211_v37, %v211_v37 }
 0x10e   :  { %v235_v43 = vadd.f32 %v234_v39, %v233_v35  ;;  %v242_v44 = vrot.slane %v241_v40, 1 }
 0x10f   :  { %v221_v45 = vsub.f32 %v219_v41, %v220_v42 }
 0x110   :  { %v236_v46 = vmul.f32 0.125, %v235_v43  ;;  %v243_v47 = vadd.f32 %v242_v44, %v241_v40  ;;  %v317_v44 = vsub.s32 4, %v538_v54 }
 0x111   :  { %v222_v48 = vadd.f32 1e-05, %v221_v45 }
 0x112   :  { %v244_v49 = vmul.f32 0.125, %v243_v47  ;;  %v245_v50 = vmul.f32 %v236_v46, %v236_v46  ;;  %v322_v47 = vsub.s32 5, %v538_v54 }
 0x113   :  { %390 = vrsqrt.f32 %v222_v48 }
 0x114   :  { %v246_v51 = vsub.f32 %v244_v49, %v245_v50 }
 0x116   :  { %v247_v52 = vadd.f32 1e-05, %v246_v51 }
 0x118   :  { %392 = vrsqrt.f32 %v247_v52 }
 0x11d   :  { %v391_v56 = vpop.eup %390 }
 0x11e   :  { %v224_v57 = vmul.f32 %v391_v56, %v543_v55 }
 0x120   :  { %v225_v61 = vmul.f32 %v224_v57, %v211_v37  ;;  %v258_v62 = vrot.slane %v224_v57, %v257_v58  ;;  %v332_v58 = vand.u32 127, %v255_v53 }
 0x122   :  { %v393_v60 = vpop.eup %392  ;;  %v227_v2 = vrot.slane %v225_v61, 7  ;;  %v259_v3 = vmul.f32 %v258_v62, %v121_v13  ;;  %vm334_vm3 = vcmp.lt.s32.totalorder %v332_v58, 64  ;;  %vm333_vm4 = vcmp.lt.s32.totalorder %v332_v58, 32 }
 0x123   :  { %v249_v63 = vmul.f32 %v393_v60, %v543_v55 }
 0x124   :  { %v229_v8 = vsub.f32 %v543_v55, %v227_v2 }
 0x125   :  { %v250_v0 = vmul.f32 %v249_v63, %v236_v46  ;;  %v263_v1 = vrot.slane %v249_v63, %v262_v59 }
 0x127   :  { %v252_v4 = vrot.slane %v250_v0, 7  ;;  %v264_v5 = vmul.f32 %v263_v1, %v200_v21 }
 0x129   :  { %v254_v6 = vsub.f32 %v543_v55, %v252_v4  ;;  %v265_v7 = vadd.f32 %v264_v5, %v259_v3 }
 0x12b   :  { %v267_v9 = vrot.slane %v254_v6, 2 }
 0x12d   :  { %v269_v11 = vadd.f32 %v267_v9, %v229_v8 }
 0x12f   :  { %v273_v12 = vrot.slane %v269_v11, %v272_v10 }
 0x131   :  { %v274_v14 = vadd.f32 %v273_v12, %v265_v7 }
 0x133   :  { %v346_v15 = vmul.f32 -1.442695, %v274_v14 }
 0x135   :  { %394 = vpow2.f32 %v346_v15 }
 0x13f   :  { %v395_v16 = vpop.eup %394 }
 0x140   :  { %v278_v17 = vadd.f32 1.0, %v395_v16 }
 0x142   :  { %396 = vrcp.f32 %v278_v17 }
 0x143   :  { %398 = vtanh.f32 %v274_v14 }
 0x14c   :  { %v397_v13 = vpop.eup %396 }
 0x14d   :  { %326 = vrot.lane.b32.xlu1 %v397_v13, %s457_s5  ;;  %284 = vrot.lane.b32.xlu0 %v397_v13, %s458_s7  ;;  %v399_v18 = vpop.eup %398  ;;  %v283_v22 = vmul.f32 %v397_v13, %v282_v20 }
 0x151   :  { %286 = vrot.lane.b32.xlu0 %v399_v18, %s457_s5 }
 0x1bf   :  { %v285_v19 = vpop.permute.xlu0 %284  ;;  %v327_v59 = vpop.permute.xlu1 %326 }
 0x1c3   :  { %v287_v21 = vpop.permute.xlu0 %286 }
 0x1c4   :  { %v288_v23 = vmul.f32 %v287_v21, %v285_v19 }
 0x1c6   :  { %v289_v24 = vadd.f32 %v288_v23, %v283_v22 }
 0x1c8   :  { %v290_v25 = vrot.slane %v289_v24, 4  ;;  %v297_v26 = vmul.f32 %v289_v24, %v289_v24  ;;  %v335_v62 = vsel %vm334_vm3, %v289_v24, 0.0 }
 0x1ca   :  { %v291_v27 = vadd.f32 %v290_v25, %v289_v24  ;;  %v298_v28 = vrot.slane %v297_v26, 4 }
 0x1cc   :  { %v292_v29 = vrot.slane %v291_v27, 2  ;;  %v299_v30 = vadd.f32 %v298_v28, %v297_v26 }
 0x1ce   :  { %v293_v31 = vadd.f32 %v292_v29, %v291_v27  ;;  %v300_v32 = vrot.slane %v299_v30, 2 }
 0x1d0   :  { %v294_v33 = vrot.slane %v293_v31, 1  ;;  %v301_v34 = vadd.f32 %v300_v32, %v299_v30 }
 0x1d2   :  { %v295_v35 = vadd.f32 %v294_v33, %v293_v31  ;;  %v302_v36 = vrot.slane %v301_v34, 1 }
 0x1d4   :  { %v296_v37 = vmul.f32 0.125, %v295_v35  ;;  %v303_v38 = vadd.f32 %v302_v36, %v301_v34 }
 0x1d6   :  { %v304_v39 = vmul.f32 0.125, %v303_v38  ;;  %v305_v40 = vmul.f32 %v296_v37, %v296_v37 }
 0x1d8   :  { %v306_v41 = vsub.f32 %v304_v39, %v305_v40 }
 0x1da   :  { %v307_v42 = vadd.f32 1e-05, %v306_v41 }
 0x1dc   :  { %400 = vrsqrt.f32 %v307_v42 }
 0x1e6   :  { %v401_v43 = vpop.eup %400 }
 0x1e7   :  { %v309_v45 = vmul.f32 %v401_v43, %v543_v55 }
 0x1e9   :  { %v310_v46 = vmul.f32 %v309_v45, %v296_v37  ;;  %v318_v49 = vrot.slane %v309_v45, %v317_v44 }
 0x1eb   :  { %v312_v48 = vrot.slane %v310_v46, 7  ;;  %v319_v51 = vmul.f32 %v318_v49, %v289_v24 }
 0x1ed   :  { %v314_v50 = vsub.f32 %v543_v55, %v312_v48 }
 0x1ef   :  { %v323_v52 = vrot.slane %v314_v50, %v322_v47 }
 0x1f1   :  { %v324_v56 = vadd.f32 %v323_v52, %v319_v51 }
 0x1f3   :  { %402 = vtanh.f32 %v324_v56 }
 0x1fd   :  { %v403_v57 = vpop.eup %402 }
 0x1fe   :  { %328 = vrot.lane.b32.xlu1 %v403_v57, %s459_s2 }
 0x270   :  { %v329_v60 = vpop.permute.xlu1 %328 }
 0x271   :  { %v330_v61 = vmul.f32 %v329_v60, %v327_v59 }
 0x273   :  { %v336_v54 = vsel %vm333_vm4, %v330_v61, %v335_v62 }
 0x274   :  { %337 = vst [vmem:[%s569_s6] sm:$0xff] %v336_v54 }
 0x275   :  { %342 = vsyncpa [#allocation3], 1 }
 0x276   :  { %343 = vsyncpa [#allocation5], 1 }

</bundles_post_ra>
